<compile_context>
chip_gen: v5e
topology: v5e:2x2
jax: 0.10.0
libtpu: 0.0.40
codegen_flags: <defaults>
</compile_context>

<pallas_src>
import functools

import jax
import jax.numpy as jnp
from jax.experimental import pallas as pl
from jax.experimental.pallas import tpu as pltpu

_VMEM_LIMIT = 48 * 1024 * 1024  # stay under v7x's 64 MiB physical VMEM


# --------------------------------------------------------------------------
# small helpers
# --------------------------------------------------------------------------
def _round_up(n, m):
    return (n + m - 1) // m * m


def _tile_and_pad(n, base, max_units):
    """Pick a tile size (multiple of `base`, at most base*max_units) and a
    padded extent it divides evenly, minimizing padding."""
    n_pad = _round_up(max(n, base), base)
    units = n_pad // base
    for c in range(min(units, max_units), 0, -1):
        if units % c == 0:
            return c * base, n_pad
    return base, n_pad


# --------------------------------------------------------------------------
# Kernel A: additive Gaussian noise + dropout (training mode), lane-dense slab
# --------------------------------------------------------------------------
def _noise_dropout_kernel(x_ref, n_ref, u_ref, o_ref, *, keep_prob, noise_std):
    x = x_ref[...] + noise_std * n_ref[...]
    keep = u_ref[...] < keep_prob
    o_ref[...] = jnp.where(keep, x * (1.0 / keep_prob), jnp.zeros_like(x))


def noise_dropout(x2d, noise2d, u2d, *, keep_prob, noise_std, tile_rows):
    rows, lane = x2d.shape
    assert rows % tile_rows == 0
    kern = functools.partial(
        _noise_dropout_kernel, keep_prob=keep_prob, noise_std=noise_std
    )
    spec = pl.BlockSpec((tile_rows, lane), lambda i: (i, 0))
    return pl.pallas_call(
        kern,
        out_shape=jax.ShapeDtypeStruct((rows, lane), jnp.float32),
        grid=(rows // tile_rows,),
        in_specs=[spec, spec, spec],
        out_specs=spec,
        compiler_params=pltpu.CompilerParams(
            dimension_semantics=("parallel",),
            vmem_limit_bytes=_VMEM_LIMIT,
        ),
    )(x2d, noise2d, u2d)


# --------------------------------------------------------------------------
# Kernel B: conv-as-matmul (transposed, lane-dense) + per-tile partial stats
# --------------------------------------------------------------------------
def _conv_stats_kernel(w_ref, p_ref, y_ref, sum_ref, ssq_ref):
    # (Cout, K) @ (K, tm) -> (Cout, tm); f32 accumulation on the MXU.
    y = jnp.dot(w_ref[...], p_ref[...], preferred_element_type=jnp.float32)
    y_ref[...] = y
    # Per-tile partial sums (lane-axis reductions -> XLU). Broadcast across the
    # 128-lane partial block so every store stays full-width / unmasked.
    s = jnp.sum(y, axis=1, keepdims=True)
    q = jnp.sum(y * y, axis=1, keepdims=True)
    sum_ref[...] = jnp.broadcast_to(s, sum_ref.shape)
    ssq_ref[...] = jnp.broadcast_to(q, ssq_ref.shape)


def conv_matmul_with_stats(w2d, patches_t, *, tm):
    Cout, Kdim = w2d.shape
    K2, M_pad = patches_t.shape
    assert Kdim == K2 and M_pad % tm == 0
    n_tiles = M_pad // tm
    return pl.pallas_call(
        _conv_stats_kernel,
        out_shape=(
            jax.ShapeDtypeStruct((Cout, M_pad), jnp.float32),
            jax.ShapeDtypeStruct((Cout, n_tiles * 128), jnp.float32),
            jax.ShapeDtypeStruct((Cout, n_tiles * 128), jnp.float32),
        ),
        grid=(n_tiles,),
        in_specs=[
            pl.BlockSpec((Cout, Kdim), lambda j: (0, 0)),  # resident weights
            pl.BlockSpec((Kdim, tm), lambda j: (0, j)),
        ],
        out_specs=(
            pl.BlockSpec((Cout, tm), lambda j: (0, j)),
            pl.BlockSpec((Cout, 128), lambda j: (0, j)),   # per-tile partials
            pl.BlockSpec((Cout, 128), lambda j: (0, j)),
        ),
        compiler_params=pltpu.CompilerParams(
            dimension_semantics=("parallel",),
            vmem_limit_bytes=_VMEM_LIMIT,
        ),
    )(w2d, patches_t)


# --------------------------------------------------------------------------
# Kernel C: BatchNorm2d (precomputed scale/shift) fused with LeakyReLU(0.2)
# --------------------------------------------------------------------------
def _bn_act_kernel(y_ref, scale_ref, shift_ref, o_ref, *, neg_slope):
    z = y_ref[...] * scale_ref[...] + shift_ref[...]
    o_ref[...] = jnp.where(z >= 0.0, z, neg_slope * z)


def bn_leakyrelu(y, scale, shift, *, neg_slope, tm):
    Cout, M_pad = y.shape
    assert M_pad % tm == 0
    kern = functools.partial(_bn_act_kernel, neg_slope=neg_slope)
    small = pl.BlockSpec((Cout, 1), lambda j: (0, 0))
    return pl.pallas_call(
        kern,
        out_shape=jax.ShapeDtypeStruct((Cout, M_pad), jnp.float32),
        grid=(M_pad // tm,),
        in_specs=[pl.BlockSpec((Cout, tm), lambda j: (0, j)), small, small],
        out_specs=pl.BlockSpec((Cout, tm), lambda j: (0, j)),
        compiler_params=pltpu.CompilerParams(
            dimension_semantics=("parallel",),
            vmem_limit_bytes=_VMEM_LIMIT,
        ),
    )(y, scale, shift)


# --------------------------------------------------------------------------
# Plain-JAX glue
# --------------------------------------------------------------------------
def _im2col_transposed(x_cnhw, k, stride, pad):
    """Build im2col patches directly in the transposed (K, M) layout,
    K = k*k*Cin, M = N*Ho*Wo, row index = (ki*k + kj)*Cin + ci."""
    C, N, H, W = x_cnhw.shape
    xp = jnp.pad(x_cnhw, ((0, 0), (0, 0), (pad, pad), (pad, pad)))
    Ho = (H + 2 * pad - k) // stride + 1
    Wo = (W + 2 * pad - k) // stride + 1
    cols = []
    for ki in range(k):
        for kj in range(k):
            cols.append(
                xp[:, :, ki:ki + stride * Ho:stride, kj:kj + stride * Wo:stride]
            )
    p = jnp.stack(cols, axis=0)                 # (k*k, C, N, Ho, Wo)
    return p.reshape(k * k * C, N * Ho * Wo), Ho, Wo


def denoising_block_forward(x_nchw, conv_w, gamma, beta, rng_key, *, stride=1,
                            upsample=False, dropout_p=0.3, noise_std=0.05,
                            eps=1e-5, neg_slope=0.2,
                            matmul_dtype=jnp.bfloat16):
    x_nchw = x_nchw.astype(jnp.float32)
    if upsample:
        # TODO(synk): bilinear 2x upsample (align_corners=False, half-pixel
        # centers) kept in plain JAX via jax.image.resize; not lowered to Pallas.
        N0, C0, H0, W0 = x_nchw.shape
        x_nchw = jax.image.resize(
            x_nchw, (N0, C0, 2 * H0, 2 * W0), method="bilinear"
        )

    N, C, H, W = x_nchw.shape
    Cout, Cin, kh, kw = conv_w.shape
    assert Cin == C and kh == kw
    k = kh
    pad = (k - 1) // 2
    keep_prob = 1.0 - dropout_p

    # ---- Kernel A: x = dropout(x + noise_std * randn_like(x)), lane-dense ----
    total = N * C * H * W
    lane_a = 512
    rows = -(-total // lane_a)
    tile_r, rows_pad = _tile_and_pad(rows, 8, 64)      # up to 512-row blocks
    padded_total = rows_pad * lane_a

    k_noise, k_drop = jax.random.split(rng_key)
    noise2d = jax.random.normal(k_noise, (rows_pad, lane_a), jnp.float32)
    u2d = jax.random.uniform(k_drop, (rows_pad, lane_a), jnp.float32)
    x2d = jnp.pad(x_nchw.reshape(-1), (0, padded_total - total))
    x2d = x2d.reshape(rows_pad, lane_a)

    x2d = noise_dropout(x2d, noise2d, u2d, keep_prob=keep_prob,
                        noise_std=noise_std, tile_rows=tile_r)
    x_nchw = x2d.reshape(-1)[:total].reshape(N, C, H, W)

    # ---- im2col glue in transposed (K, M) layout ----
    x_cnhw = jnp.transpose(x_nchw, (1, 0, 2, 3))
    patches_t, Ho, Wo = _im2col_transposed(x_cnhw, k, stride, pad)  # (K, M)
    Kdim, M = patches_t.shape
    w2d = conv_w.transpose(0, 2, 3, 1).reshape(Cout, Kdim)          # (Cout, K)

    tm, M_pad = _tile_and_pad(M, 128, 16)              # lane-dense M tiles
    if M_pad != M:
        # zero patch columns contribute y == 0, so batch stats stay exact
        patches_t = jnp.pad(patches_t, ((0, 0), (0, M_pad - M)))
    patches_t = patches_t.astype(matmul_dtype)
    w2d = w2d.astype(matmul_dtype)

    # ---- Kernel B: conv matmul + per-tile partial stats ----
    y, psum, pssq = conv_matmul_with_stats(w2d, patches_t, tm=tm)

    # ---- tiny stats reduction + BN parameter precompute (plain JAX) ----
    n_tiles = M_pad // tm
    count = float(M)
    ch_sum = psum.reshape(Cout, n_tiles, 128)[:, :, 0].sum(axis=1)
    ch_ssq = pssq.reshape(Cout, n_tiles, 128)[:, :, 0].sum(axis=1)
    mean = ch_sum / count
    var = jnp.maximum(ch_ssq / count - mean * mean, 0.0)   # biased batch var
    scale = gamma.astype(jnp.float32) * jax.lax.rsqrt(var + eps)
    shift = beta.astype(jnp.float32) - mean * scale
    scale = scale.reshape(Cout, 1)
    shift = shift.reshape(Cout, 1)

    # ---- Kernel C: fused BN affine + LeakyReLU(0.2) ----
    out_t = bn_leakyrelu(y, scale, shift, neg_slope=neg_slope, tm=tm)

    out = out_t[:, :M].reshape(Cout, N, Ho, Wo).transpose(1, 0, 2, 3)
    return out


# --------------------------------------------------------------------------
if __name__ == "__main__":
    key = jax.random.PRNGKey(0)
    kx, kw, krng = jax.random.split(key, 3)

    # DenoisingBlock(in_features=4, out_features=8, kernel=3, stride=1,
    #                bias=False, upsample=False)
    N, Cin, H, W = 2, 4, 16, 16
    Cout, k = 8, 3

    x = jax.random.normal(kx, (N, Cin, H, W), dtype=jnp.float32)
    fan_in = Cin * k * k
    conv_w = jax.random.normal(kw, (Cout, Cin, k, k), dtype=jnp.float32)
    conv_w = conv_w / jnp.sqrt(fan_in)
    gamma = jnp.ones((Cout,), jnp.float32)   # BatchNorm2d default weight init
    beta = jnp.zeros((Cout,), jnp.float32)   # BatchNorm2d default bias init

    out = denoising_block_forward(x, conv_w, gamma, beta, krng,
                                  stride=1, upsample=False)
    out = jax.block_until_ready(out)

    assert out.shape == (N, Cout, H, W), out.shape
    assert bool(jnp.all(jnp.isfinite(out)))
    print("KERNEL_OK")
</pallas_src>

<mosaic_0001>
module attributes {stable_mosaic.version = 11 : i64} {
  func.func @_noise_dropout_kernel(%arg0: i32, %arg1: memref<8x512xf32, #tpu.memory_space<vmem>>, %arg2: memref<8x512xf32, #tpu.memory_space<vmem>>, %arg3: memref<8x512xf32, #tpu.memory_space<vmem>>, %arg4: memref<8x512xf32, #tpu.memory_space<vmem>>) attributes {dimension_semantics = [#tpu.dimension_semantics<parallel>], iteration_bounds = array<i64: 1>, scalar_prefetch = 0 : i64, scratch_operands = 0 : i64, tpu.core_type = #tpu.core_type<tc>, window_params = [{transform_indices = @transform_0, window_bounds = array<i64: 8, 512>}, {transform_indices = @transform_1, window_bounds = array<i64: 8, 512>}, {transform_indices = @transform_2, window_bounds = array<i64: 8, 512>}, {transform_indices = @transform_3, window_bounds = array<i64: 8, 512>}]} {
    %c0 = arith.constant 0 : index
    %c0_0 = arith.constant 0 : index
    %0 = vector.load %arg1[%c0, %c0_0] : memref<8x512xf32, #tpu.memory_space<vmem>>, vector<8x512xf32>
    %c0_1 = arith.constant 0 : index
    %c0_2 = arith.constant 0 : index
    %1 = vector.load %arg2[%c0_1, %c0_2] : memref<8x512xf32, #tpu.memory_space<vmem>>, vector<8x512xf32>
    %cst = arith.constant 5.000000e-02 : f32
    %2 = vector.broadcast %cst : f32 to vector<8x512xf32>
    %3 = arith.mulf %2, %1 : vector<8x512xf32>
    %4 = arith.addf %0, %3 : vector<8x512xf32>
    %c0_3 = arith.constant 0 : index
    %c0_4 = arith.constant 0 : index
    %5 = vector.load %arg3[%c0_3, %c0_4] : memref<8x512xf32, #tpu.memory_space<vmem>>, vector<8x512xf32>
    %cst_5 = arith.constant 0.699999988 : f32
    %6 = vector.broadcast %cst_5 : f32 to vector<8x512xf32>
    %7 = arith.cmpf olt, %5, %6 : vector<8x512xf32>
    %cst_6 = arith.constant 1.42857146 : f32
    %8 = vector.broadcast %cst_6 : f32 to vector<8x512xf32>
    %9 = arith.mulf %4, %8 : vector<8x512xf32>
    %cst_7 = arith.constant 0.000000e+00 : f32
    %10 = vector.broadcast %cst_7 : f32 to vector<8x512xf32>
    %11 = arith.select %7, %9, %10 : vector<8x512xi1>, vector<8x512xf32>
    %c0_8 = arith.constant 0 : index
    %c0_9 = arith.constant 0 : index
    %12 = vector.load %arg4[%c0_8, %c0_9] : memref<8x512xf32, #tpu.memory_space<vmem>>, vector<8x512xf32>
    tpu.vector_store %arg4[%c0_8, %c0_9], %11 {strides = array<i32>} : memref<8x512xf32, #tpu.memory_space<vmem>>, vector<8x512xf32>,
    return
  }
  func.func @transform_0(%arg0: i32) -> (i32, i32) {
    %c0_i32 = arith.constant 0 : i32
    %c0_i32_0 = arith.constant 0 : i32
    return %arg0, %c0_i32 : i32, i32
  }
  func.func @transform_1(%arg0: i32) -> (i32, i32) {
    %c0_i32 = arith.constant 0 : i32
    %c0_i32_0 = arith.constant 0 : i32
    return %arg0, %c0_i32 : i32, i32
  }
  func.func @transform_2(%arg0: i32) -> (i32, i32) {
    %c0_i32 = arith.constant 0 : i32
    %c0_i32_0 = arith.constant 0 : i32
    return %arg0, %c0_i32 : i32, i32
  }
  func.func @transform_3(%arg0: i32) -> (i32, i32) {
    %c0_i32 = arith.constant 0 : i32
    %c0_i32_0 = arith.constant 0 : i32
    return %arg0, %c0_i32 : i32, i32
  }
}

</mosaic_0001>

<bundles_post_ra>
// kernel: tpu_custom_call.1
= control target key start
LH: loop header
LB: loop body
LE: loop exit
PB: predicated region body
PF: predicated region fallthrough
CT: control target
= control target key end

     0   :  { %8 = vsyncpa [#allocation3], 0  ;;  %s253_s0 = inlined_call_operand.hbm [shape: f32[8,512], index: 0, kind: input, shape index: {}]   ;;  %s254_s1 = inlined_call_operand.hbm [shape: f32[8,512], index: 1, kind: input, shape index: {}]   ;;  %s255_s2 = inlined_call_operand.hbm [shape: f32[8,512], index: 2, kind: input, shape index: {}]   ;;  %s256_s3 = inlined_call_operand.hbm [shape: f32[8,512], index: 3, kind: output, shape index: {}]  }
   0x1   :  { %9 = vsyncpa [#allocation6], 0  ;;  %s27_s14 = sshll.u32 %s254_s1, 4  ;;  %s28_s14 = int_to_ptr.hbm [resolvable:$true] %s27_s14 }
   0x2   :  { %10 = vsyncpa [#allocation4], 0  ;;  %s216_s15 = smov [#allocation5]   ;;  %s16_s19 = sshll.u32 %s253_s0, 4  ;;  %s17_s19 = int_to_ptr.hbm [resolvable:$true] %s16_s19 }
   0x3   :  { %s29_s16 = sshll.u32 %s216_s15, 4  ;;  %s217_s20 = smov [#allocation2]   ;;  %s30_s16 = int_to_ptr.vmem [resolvable:$true] %s29_s16 }
   0x4   :  { %32 = dma.hbm_to_vmem [thread:$0]  %s28_s14, 512, %s30_s16, [#allocation6]  }
   0x5   :  { %s18_s21 = sshll.u32 %s217_s20, 4  ;;  %s38_s24 = sshll.u32 %s255_s2, 4  ;;  %s19_s21 = int_to_ptr.vmem [resolvable:$true] %s18_s21  ;;  %s39_s24 = int_to_ptr.hbm [resolvable:$true] %s38_s24 }
   0x6   :  { %21 = dma.hbm_to_vmem [thread:$0]  %s17_s19, 512, %s19_s21, [#allocation3]  }
   0x7   :  { %s218_s1 = smov [#allocation7]  }
   0x8   :  { %s40_s25 = sshll.u32 %s218_s1, 4  ;;  %s41_s25 = int_to_ptr.vmem [resolvable:$true] %s40_s25 }
   0x9   :  { %43 = dma.hbm_to_vmem [thread:$0]  %s39_s24, 512, %s41_s25, [#allocation6]  }
   0xa   :  { %210 = dma.done.wait [#allocation3], 512  }
   0xb   :  { %211 = vsyncadd [#allocation3], 4294966784 }
   0xc   :  { %212 = dma.done.wait [#allocation6], 1024  }
   0xd   :  { %213 = vsyncadd [#allocation6], 4294966272  ;;  %v56_v0 = vld [vmem:[#allocation2] sm:$0xff]  ;;  %v57_v4 = vld [vmem:[#allocation2 + $0x8] sm:$0xff]  ;;  %s219_s0 = smov [#allocation8]   ;;  %s99_s28 = sshll.u32 %s256_s3, 4  ;;  %s100_s28 = int_to_ptr.hbm [resolvable:$true] %s99_s28 }
   0xe   :  { %v60_v1 = vld [vmem:[#allocation5] sm:$0xff]  ;;  %v61_v5 = vld [vmem:[#allocation5 + $0x8] sm:$0xff]  ;;  %v58_v8 = vld [vmem:[#allocation2 + $0x10] sm:$0xff]  ;;  %s97_s2 = sshll.u32 %s219_s0, 4  ;;  %s98_s2 = int_to_ptr.vmem [resolvable:$true] %s97_s2 }
   0xf   :  { %v64_v2 = vmul.f32 0.05, %v60_v1  ;;  %v72_v3 = vld [vmem:[#allocation7] sm:$0xff]  ;;  %v65_v6 = vmul.f32 0.05, %v61_v5  ;;  %v73_v7 = vld [vmem:[#allocation7 + $0x8] sm:$0xff] }
  0x10   :  { %v62_v9 = vld [vmem:[#allocation5 + $0x10] sm:$0xff]  ;;  %vm76_vm0 = vcmp.lt.f32.partialorder %v72_v3, 0.7  ;;  %vm77_vm1 = vcmp.lt.f32.partialorder %v73_v7, 0.7  ;;  %v59_v14 = vld [vmem:[#allocation2 + $0x18] sm:$0xff] }
  0x11   :  { %v68_v10 = vadd.f32 %v64_v2, %v56_v0  ;;  %v66_v11 = vmul.f32 0.05, %v62_v9  ;;  %v74_v12 = vld [vmem:[#allocation7 + $0x10] sm:$0xff]  ;;  %v69_v13 = vadd.f32 %v65_v6, %v57_v4  ;;  %v63_v15 = vld [vmem:[#allocation5 + $0x18] sm:$0xff] }
  0x12   :  { %v67_v18 = vmul.f32 0.05, %v63_v15  ;;  %v75_v19 = vld [vmem:[#allocation7 + $0x18] sm:$0xff]  ;;  %vm78_vm2 = vcmp.lt.f32.partialorder %v74_v12, 0.7 }
  0x13   :  { %v80_v16 = vmul.f32 1.4285715, %v68_v10  ;;  %v70_v17 = vadd.f32 %v66_v11, %v58_v8  ;;  %v81_v20 = vmul.f32 1.4285715, %v69_v13  ;;  %vm79_vm3 = vcmp.lt.f32.partialorder %v75_v19, 0.7 }
  0x14   :  { %v71_v23 = vadd.f32 %v67_v18, %v59_v14 }
  0x15   :  { %v84_v21 = vsel %vm76_vm0, %v80_v16, 0.0  ;;  %v82_v22 = vmul.f32 1.4285715, %v70_v17  ;;  %v85_v24 = vsel %vm77_vm1, %v81_v20, 0.0 }
  0x16   :  { %88 = vst [vmem:[#allocation8] sm:$0xff] %v84_v21  ;;  %v83_v26 = vmul.f32 1.4285715, %v71_v23 }
  0x17   :  { %89 = vst [vmem:[#allocation8 + $0x8] sm:$0xff] %v85_v24  ;;  %v86_v25 = vsel %vm78_vm2, %v82_v22, 0.0 }
  0x18   :  { %90 = vst [vmem:[#allocation8 + $0x10] sm:$0xff] %v86_v25  ;;  %v87_v27 = vsel %vm79_vm3, %v83_v26, 0.0 }
  0x19   :  { %91 = vst [vmem:[#allocation8 + $0x18] sm:$0xff] %v87_v27 }
  0x1a   :  { %102 = dma.vmem_to_hbm [thread:$0]  %s98_s2, 512, %s100_s28, [#allocation4]  }
  0x1b   :  { %214 = dma.done.wait [#allocation4], 512  }
  0x1c   :  { %215 = vsyncadd [#allocation4], 4294966784 }
  0x1d   :  { %107 = vsyncpa [#allocation3], 1 }
  0x1e   :  { %108 = vsyncpa [#allocation6], 1 }
  0x1f   :  { %109 = vsyncpa [#allocation4], 1 }

</bundles_post_ra>
